<compile_context>
chip_gen: v7x
topology: tpu7x:2x2x1
jax: 0.10.0
libtpu: 0.0.40
codegen_flags: <defaults>
</compile_context>

<pallas_src>
import functools

import jax
import jax.numpy as jnp
from jax.experimental import pallas as pl
from jax.experimental.pallas import tpu as pltpu

_LANE = 128  # vreg lane width; the batch axis maps to lanes in this kernel


def _round_up(n, m):
    return ((n + m - 1) // m) * m


def _mlp_kernel(n_layers, x_ref, *refs):
    """Fused transposed MLP on one batch tile.

    refs = (w0_t, b0_t, w1_t, b1_t, ..., w_out_t, b_out_t, o_ref).
    Everything is feature-major / batch-on-lanes:
      x_ref : (in_dim, tb)    bf16   (pipelined per batch tile)
      w_t   : (out, in)       bf16   (resident, constant index_map)
      b_t   : (out, 1)        f32    (resident, constant index_map)
      o_ref : (head_dim, tb)  f32    (compact, lane-dense output)
    The last (W, b) pair is the output head (no ReLU after it).
    """
    o_ref = refs[-1]
    param_refs = refs[:-1]
    assert len(param_refs) == 2 * n_layers

    h = x_ref[...]                                    # (in_dim, tb) bf16
    for i in range(n_layers):
        w = param_refs[2 * i][...]                    # (out, in) bf16
        b = param_refs[2 * i + 1][...]                # (out, 1)  f32
        # bf16 x bf16 -> f32 accumulation on the MXU (for the first layer the
        # astype is a no-op since x is already bf16); bias add in f32 on VPU.
        h = jnp.dot(w, h.astype(w.dtype),
                    preferred_element_type=jnp.float32) + b
        if i < n_layers - 1:
            # ReLU after every hidden Linear; Dropout(p=0.0) == identity.
            h = jnp.maximum(h, 0.0)
    o_ref[...] = h.astype(o_ref.dtype)                # (head_dim, tb)


def mlp_forward(x, params, *, block_batch=2048, param_dtype=jnp.bfloat16):
    """Run the fused MLP kernel.

    x:       (batch, input_dim) float32
    params:  list of (W, b) with W of shape (in, out) float32, b of shape
             (1, out) float32.  The final pair is the output head (out == 1).
    Returns: (batch,) float32   (the .squeeze(-1) of the PyTorch module)
    """
    batch, input_dim = x.shape
    n_layers = len(params)
    dims = [input_dim] + [w.shape[1] for (w, _) in params]
    head_dim = dims[-1]

    # ---- batch maps to the lane axis -> tiles are 128-aligned (or full extent).
    padded0 = _round_up(batch, _LANE)
    tb = min(_round_up(block_batch, _LANE), padded0)
    if padded0 // tb < 2 and padded0 >= 2 * _LANE:
        # v7x megacore: keep >= 2 grid blocks so ("parallel",) uses both TCs.
        tb = _round_up(padded0 // 2, _LANE)
    padded_batch = _round_up(batch, tb)
    n_blocks = padded_batch // tb

    # ---- single fused pad + cast + transpose pass over x (bf16 halves the
    # stream; no feature padding; batch padding skipped when already aligned).
    x_t = x.astype(param_dtype).T                              # (in_dim, batch)
    if padded_batch != batch:
        x_t = jnp.zeros((input_dim, padded_batch), param_dtype
                        ).at[:, :batch].set(x_t)

    flat_args = [x_t]
    in_specs = [pl.BlockSpec((input_dim, tb), lambda i: (0, i))]
    for (w, b) in params:
        w_t = jnp.asarray(w, param_dtype).T                    # (out, in)  bf16
        b_t = jnp.asarray(b, jnp.float32).T                    # (out, 1)   f32
        flat_args.append(w_t)
        flat_args.append(b_t)
        # Weights/biases stay resident across all batch tiles.
        in_specs.append(pl.BlockSpec(w_t.shape, lambda i: (0, 0)))
        in_specs.append(pl.BlockSpec(b_t.shape, lambda i: (0, 0)))

    out_spec = pl.BlockSpec((head_dim, tb), lambda i: (0, i))

    # Advisory cost estimate for the XLA scheduler.
    flops = 2 * padded_batch * sum(dims[i] * dims[i + 1] for i in range(n_layers))
    bytes_accessed = (sum(a.size * a.dtype.itemsize for a in flat_args)
                      + head_dim * padded_batch * 4)

    kernel = functools.partial(_mlp_kernel, n_layers)

    out_t = pl.pallas_call(
        kernel,
        out_shape=jax.ShapeDtypeStruct((head_dim, padded_batch), jnp.float32),
        grid_spec=pltpu.PrefetchScalarGridSpec(
            num_scalar_prefetch=0,
            grid=(n_blocks,),
            in_specs=in_specs,
            out_specs=out_spec,
        ),
        compiler_params=pltpu.CompilerParams(
            dimension_semantics=("parallel",),     # megacore splits the batch
            vmem_limit_bytes=32 * 1024 * 1024,     # > v5e 16 MiB default, < v7x 64 MiB
        ),
        cost_estimate=pl.CostEstimate(
            flops=flops, transcendentals=0, bytes_accessed=bytes_accessed),
    )(*flat_args)

    out = out_t[:, :batch]                         # (head_dim, batch)
    if head_dim == 1:
        return out[0]                              # PyTorch .squeeze(-1)
    return out.T


def init_mlp_params(key, input_dim, n_hidden=1, hidden_size=64):
    """Deterministic init mirroring PyTorch nn.Linear default:
    U(-1/sqrt(fan_in), 1/sqrt(fan_in)) for both weight and bias.
    Weights are stored transposed vs torch, i.e. shape (in, out); kept f32
    (the wrapper casts weights to bf16 for the MXU — they stay resident)."""
    dims = [input_dim] + [hidden_size] * n_hidden + [1]
    params = []
    for i in range(len(dims) - 1):
        fan_in, fan_out = dims[i], dims[i + 1]
        key, kw, kb = jax.random.split(key, 3)
        bound = 1.0 / (fan_in ** 0.5)
        w = jax.random.uniform(kw, (fan_in, fan_out), jnp.float32,
                               minval=-bound, maxval=bound)
        b = jax.random.uniform(kb, (1, fan_out), jnp.float32,
                               minval=-bound, maxval=bound)
        params.append((w, b))
    return params


def mlp_reference(x, params, param_dtype=jnp.bfloat16):
    """Pure-JAX reference using the same bf16-input / bf16-weight /
    f32-accumulate recipe as the kernel, for a tight correctness check."""
    h = x
    n_layers = len(params)
    for i, (w, b) in enumerate(params):
        h = jnp.dot(h.astype(param_dtype), w.astype(param_dtype),
                    preferred_element_type=jnp.float32) + b
        if i < n_layers - 1:
            h = jnp.maximum(h, 0.0)
    return h[:, 0]


if __name__ == "__main__":
    key = jax.random.PRNGKey(0)
    key, kx = jax.random.split(key)

    batch = 8
    input_dim = 32
    n_hidden = 2
    hidden_size = 64

    x = jax.random.normal(kx, (batch, input_dim), jnp.float32)
    params = init_mlp_params(key, input_dim, n_hidden=n_hidden,
                             hidden_size=hidden_size)

    out = mlp_forward(x, params)
    out = jax.block_until_ready(out)

    ref = mlp_reference(x, params)
    assert out.shape == (batch,), out.shape
    assert jnp.allclose(out, ref, atol=1e-3, rtol=1e-3), (out, ref)

    print("KERNEL_OK")
</pallas_src>

<mosaic_0001>
module attributes {stable_mosaic.version = 11 : i64} {
  func.func @_mlp_kernel(%arg0: i32, %arg1: memref<32x128xbf16, #tpu.memory_space<vmem>>, %arg2: memref<64x32xbf16, #tpu.memory_space<vmem>>, %arg3: memref<64x1xf32, #tpu.memory_space<vmem>>, %arg4: memref<64x64xbf16, #tpu.memory_space<vmem>>, %arg5: memref<64x1xf32, #tpu.memory_space<vmem>>, %arg6: memref<1x64xbf16, #tpu.memory_space<vmem>>, %arg7: memref<1x1xf32, #tpu.memory_space<vmem>>, %arg8: memref<1x128xf32, #tpu.memory_space<vmem>>) attributes {dimension_semantics = [#tpu.dimension_semantics<parallel>], iteration_bounds = array<i64: 1>, scalar_prefetch = 0 : i64, scratch_operands = 0 : i64, tpu.core_type = #tpu.core_type<tc>, window_params = [{transform_indices = @transform_0, window_bounds = array<i64: 32, 128>}, {pipeline_mode = #tpu.pipeline_mode<synchronous>, transform_indices = @transform_1, window_bounds = array<i64: 64, 32>}, {pipeline_mode = #tpu.pipeline_mode<synchronous>, transform_indices = @transform_2, window_bounds = array<i64: 64, 1>}, {pipeline_mode = #tpu.pipeline_mode<synchronous>, transform_indices = @transform_3, window_bounds = array<i64: 64, 64>}, {pipeline_mode = #tpu.pipeline_mode<synchronous>, transform_indices = @transform_4, window_bounds = array<i64: 64, 1>}, {pipeline_mode = #tpu.pipeline_mode<synchronous>, transform_indices = @transform_5, window_bounds = array<i64: 1, 64>}, {pipeline_mode = #tpu.pipeline_mode<synchronous>, transform_indices = @transform_6, window_bounds = array<i64: 1, 1>}, {transform_indices = @transform_7, window_bounds = array<i64: 1, 128>}]} {
    %c0 = arith.constant 0 : index
    %c0_0 = arith.constant 0 : index
    %0 = vector.load %arg1[%c0, %c0_0] : memref<32x128xbf16, #tpu.memory_space<vmem>>, vector<32x128xbf16>
    %c0_1 = arith.constant 0 : index
    %c0_2 = arith.constant 0 : index
    %1 = vector.load %arg2[%c0_1, %c0_2] : memref<64x32xbf16, #tpu.memory_space<vmem>>, vector<64x32xbf16>
    %c0_3 = arith.constant 0 : index
    %c0_4 = arith.constant 0 : index
    %2 = vector.load %arg3[%c0_3, %c0_4] : memref<64x1xf32, #tpu.memory_space<vmem>>, vector<64x1xf32>
    %cst = arith.constant dense<0.000000e+00> : vector<64x128xf32>
    %3 = tpu.matmul %1, %0, %cst {dimension_numbers = #tpu.dot_dimension_numbers<[1], [0], [0], [1], [0, 0, 1, 1], [], []>} : vector<64x32xbf16>, vector<32x128xbf16>, vector<64x128xf32> -> vector<64x128xf32>
    %4 = vector.broadcast %2 : vector<64x1xf32> to vector<64x128xf32>
    %5 = arith.addf %3, %4 : vector<64x128xf32>
    %cst_5 = arith.constant 0.000000e+00 : f32
    %6 = vector.broadcast %cst_5 : f32 to vector<64x128xf32>
    %7 = arith.maximumf %5, %6 : vector<64x128xf32>
    %c0_6 = arith.constant 0 : index
    %c0_7 = arith.constant 0 : index
    %8 = vector.load %arg4[%c0_6, %c0_7] : memref<64x64xbf16, #tpu.memory_space<vmem>>, vector<64x64xbf16>
    %c0_8 = arith.constant 0 : index
    %c0_9 = arith.constant 0 : index
    %9 = vector.load %arg5[%c0_8, %c0_9] : memref<64x1xf32, #tpu.memory_space<vmem>>, vector<64x1xf32>
    %10 = arith.truncf %7 : vector<64x128xf32> to vector<64x128xbf16>
    %cst_10 = arith.constant dense<0.000000e+00> : vector<64x128xf32>
    %11 = tpu.matmul %8, %10, %cst_10 {dimension_numbers = #tpu.dot_dimension_numbers<[1], [0], [0], [1], [0, 0, 1, 1], [], []>} : vector<64x64xbf16>, vector<64x128xbf16>, vector<64x128xf32> -> vector<64x128xf32>
    %12 = vector.broadcast %9 : vector<64x1xf32> to vector<64x128xf32>
    %13 = arith.addf %11, %12 : vector<64x128xf32>
    %cst_11 = arith.constant 0.000000e+00 : f32
    %14 = vector.broadcast %cst_11 : f32 to vector<64x128xf32>
    %15 = arith.maximumf %13, %14 : vector<64x128xf32>
    %c0_12 = arith.constant 0 : index
    %c0_13 = arith.constant 0 : index
    %16 = vector.load %arg6[%c0_12, %c0_13] : memref<1x64xbf16, #tpu.memory_space<vmem>>, vector<1x64xbf16>
    %c0_14 = arith.constant 0 : index
    %c0_15 = arith.constant 0 : index
    %17 = vector.load %arg7[%c0_14, %c0_15] : memref<1x1xf32, #tpu.memory_space<vmem>>, vector<1x1xf32>
    %18 = arith.truncf %15 : vector<64x128xf32> to vector<64x128xbf16>
    %cst_16 = arith.constant dense<0.000000e+00> : vector<1x128xf32>
    %19 = tpu.matmul %16, %18, %cst_16 {dimension_numbers = #tpu.dot_dimension_numbers<[1], [0], [0], [1], [0, 0, 1, 1], [], []>} : vector<1x64xbf16>, vector<64x128xbf16>, vector<1x128xf32> -> vector<1x128xf32>
    %20 = vector.broadcast %17 : vector<1x1xf32> to vector<1x128xf32>
    %21 = arith.addf %19, %20 : vector<1x128xf32>
    %c0_17 = arith.constant 0 : index
    %c0_18 = arith.constant 0 : index
    %22 = vector.load %arg8[%c0_17, %c0_18] : memref<1x128xf32, #tpu.memory_space<vmem>>, vector<1x128xf32>
    tpu.vector_store %arg8[%c0_17, %c0_18], %21 {strides = array<i32>} : memref<1x128xf32, #tpu.memory_space<vmem>>, vector<1x128xf32>,
    return
  }
  func.func @transform_0(%arg0: i32) -> (i32, i32) {
    %c0_i32 = arith.constant 0 : i32
    %c0_i32_0 = arith.constant 0 : i32
    return %c0_i32, %arg0 : i32, i32
  }
  func.func @transform_1(%arg0: i32) -> (i32, i32) {
    %c0_i32 = arith.constant 0 : i32
    %c0_i32_0 = arith.constant 0 : i32
    %c0_i32_1 = arith.constant 0 : i32
    return %c0_i32, %c0_i32_0 : i32, i32
  }
  func.func @transform_2(%arg0: i32) -> (i32, i32) {
    %c0_i32 = arith.constant 0 : i32
    %c0_i32_0 = arith.constant 0 : i32
    %c0_i32_1 = arith.constant 0 : i32
    return %c0_i32, %c0_i32_0 : i32, i32
  }
  func.func @transform_3(%arg0: i32) -> (i32, i32) {
    %c0_i32 = arith.constant 0 : i32
    %c0_i32_0 = arith.constant 0 : i32
    %c0_i32_1 = arith.constant 0 : i32
    return %c0_i32, %c0_i32_0 : i32, i32
  }
  func.func @transform_4(%arg0: i32) -> (i32, i32) {
    %c0_i32 = arith.constant 0 : i32
    %c0_i32_0 = arith.constant 0 : i32
    %c0_i32_1 = arith.constant 0 : i32
    return %c0_i32, %c0_i32_0 : i32, i32
  }
  func.func @transform_5(%arg0: i32) -> (i32, i32) {
    %c0_i32 = arith.constant 0 : i32
    %c0_i32_0 = arith.constant 0 : i32
    %c0_i32_1 = arith.constant 0 : i32
    return %c0_i32, %c0_i32_0 : i32, i32
  }
  func.func @transform_6(%arg0: i32) -> (i32, i32) {
    %c0_i32 = arith.constant 0 : i32
    %c0_i32_0 = arith.constant 0 : i32
    %c0_i32_1 = arith.constant 0 : i32
    return %c0_i32, %c0_i32_0 : i32, i32
  }
  func.func @transform_7(%arg0: i32) -> (i32, i32) {
    %c0_i32 = arith.constant 0 : i32
    %c0_i32_0 = arith.constant 0 : i32
    return %c0_i32, %arg0 : i32, i32
  }
}

</mosaic_0001>

<bundles_post_ra>
// kernel: tpu_custom_call.1
= control target key start
LH: loop header
LB: loop body
LE: loop exit
PB: predicated region body
PF: predicated region fallthrough
CT: control target
= control target key end

     0   :  { %s714_s0 = inlined_call_operand.vmem [shape: bf16[32,128], index: 0, kind: input, shape index: {}]   ;;  %s715_s1 = inlined_call_operand.vmem [shape: bf16[64,32], index: 1, kind: input, shape index: {}]   ;;  %s716_s2 = inlined_call_operand.vmem [shape: f32[64,1], index: 2, kind: input, shape index: {}]   ;;  %s717_s3 = inlined_call_operand.vmem [shape: bf16[64,64], index: 3, kind: input, shape index: {}]   ;;  %s718_s4 = inlined_call_operand.vmem [shape: f32[64,1], index: 4, kind: input, shape index: {}]   ;;  %s719_s5 = inlined_call_operand.vmem [shape: bf16[1,64], index: 5, kind: input, shape index: {}]   ;;  %s720_s6 = inlined_call_operand.<no memory space> [shape: f32[1,1], index: 6, kind: input, shape index: {}]   ;;  %s721_s7 = inlined_call_operand.hbm [shape: f32[1,128], index: 7, kind: output, shape index: {}]  }
   0x1   :  { %v12_v0 = vstv %s720_s6 }
   0x2   :  { %13 = vst [vmem:[#allocation2] sm:$0x1] %v12_v0 }
   0x3   :  { %v531_v1 = vld [vmem:[%s714_s0] sm:$0xff]   ;;  %vm122_vm0 = vcmask 261120   ;;  %v532_v2 = vld [vmem:[%s714_s0 + $0x8] sm:$0xff]   ;;  %v565_v4 = vmov 0   ;;  %v44_v7 = vld [vmem:[%s716_s2 + $0x10] sm:$0xff] }
   0x4   :  { %485 = vmatprep.subr.bf16.mxu0 %v531_v1  ;;  %v533_v3 = vld [vmem:[%s715_s1] sm:$0xff]   ;;  %529 = vset.pattern.permute.xlu0 %v565_v4  ;;  %v534_v5 = vld [vmem:[%s715_s1 + $0x8] sm:$0xff]   ;;  %v535_v8 = vld [vmem:[%s715_s1 + $0x10] sm:$0xff]  }
   0x5   :  { %486 = vmatpush3.bf16.msra.mxu0 %v531_v1  ;;  %530 = vset.pattern.permute.xlu1 %v565_v4  ;;  %v42_v6 = vld [vmem:[%s716_s2] sm:$0xff]  ;;  %v43_v9 = vld [vmem:[%s716_s2 + $0x8] sm:$0xff]  ;;  %v45_v10 = vld [vmem:[%s716_s2 + $0x18] sm:$0xff] }
   0x6   :  { %487 = vmatprep.subr.bf16.mxu0 %v532_v2  ;;  %489 = vmatprep.mubr.msk.bf16.mxu0 %vm122_vm0, %v533_v3  ;;  %v46_v11 = vld [vmem:[%s716_s2 + $0x20] sm:$0xff]  ;;  %v47_v12 = vld [vmem:[%s716_s2 + $0x28] sm:$0xff]  ;;  %v536_v13 = vld [vmem:[%s715_s1 + $0x18] sm:$0xff]  }
   0x7   :  { %52 = vperm.xlu0 %529, %v42_v6   ;;  %62 = vperm.xlu1 %530, %v44_v7  }
   0x9   :  { %488 = vmatpush3.bf16.msra.mxu0 %v532_v2 }
   0xb   :  { %57 = vperm.xlu0 %529, %v43_v9   ;;  %67 = vperm.xlu1 %530, %v45_v10  }
   0xc   :  { %490 = vmatmul.mubr.msk.bf16.vlgmr.msra.gmra.mrb[0].mxu0 %vm122_vm0, %v534_v5 }
   0xd   :  { %493 = vmatprep.mubr.msk.bf16.mxu0 %vm122_vm0, %v535_v8 }
   0xe   :  { %14 = vsyncpa [#allocation4], 0  ;;  %v48_v14 = vld [vmem:[%s716_s2 + $0x30] sm:$0xff]  ;;  %v49_v15 = vld [vmem:[%s716_s2 + $0x38] sm:$0xff]  ;;  %vm288_vm1 = vcmask 523264   ;;  %v566_v1 = vmov 0.0  }
   0xf   :  { %72 = vperm.xlu0 %529, %v46_v11   ;;  %77 = vperm.xlu1 %530, %v47_v12   ;;  %v216_v16 = vld [vmem:[%s718_s4] sm:$0xff]  ;;  %v217_v17 = vld [vmem:[%s718_s4 + $0x8] sm:$0xff]  ;;  %v218_v18 = vld [vmem:[%s718_s4 + $0x10] sm:$0xff]  ;;  %vm567_vm2 = vmmov 0   ;;  %s568_s26 = smov [#allocation3]  }
  0x10   :  { %v219_v19 = vld [vmem:[%s718_s4 + $0x18] sm:$0xff]  ;;  %v220_v20 = vld [vmem:[%s718_s4 + $0x20] sm:$0xff]  ;;  %v221_v21 = vld [vmem:[%s718_s4 + $0x28] sm:$0xff]  ;;  %513 = vmatprep.subr.bf16.mxu0 %v566_v1  ;;  %s439_s27 = sshll.u32 %s568_s26, 4  ;;  %s440_s27 = int_to_ptr.vmem [resolvable:$true] %s439_s27 }
  0x11   :  { %v222_v22 = vld [vmem:[%s718_s4 + $0x30] sm:$0xff]  ;;  %v223_v23 = vld [vmem:[%s718_s4 + $0x38] sm:$0xff]  ;;  %v375_v24 = vld [vmem:[#allocation2] sm:$0x1]  ;;  %s541_s28 = scalar_lea.vmem %s440_s27, 16  ;;  %s545_s29 = scalar_lea.vmem %s440_s27, 32 }
  0x12   :  { %v537_v25 = vld [vmem:[%s717_s3] sm:$0xff]   ;;  %v538_v62 = vld [vmem:[%s717_s3 + $0x8] sm:$0xff]   ;;  %v539_v63 = vld [vmem:[%s717_s3 + $0x10] sm:$0xff]   ;;  %p542_p0 = scmp.ne.s32.totalorder %s440_s27, %s541_s28  ;;  %p546_p1 = scmp.lt.s32.totalorder %s440_s27, %s440_s27 }
  0x13   :  { %82 = vperm.xlu0 %529, %v48_v14   ;;  %87 = vperm.xlu1 %530, %v49_v15   ;;  %v540_v0 = vld [vmem:[%s717_s3 + $0x18] sm:$0xff]   ;;  %p547_p2 = scmp.lt.s32.totalorder %s545_s29, %s541_s28 }
  0x14   :  { %494 = vmatmul.mubr.msk.bf16.gmra.mrb[4].mxu0 %vm122_vm0, %v536_v13  ;;  %505 = vmatprep.mubr.msk.bf16.mxu1 %vm288_vm1, %v537_v25 }
  0x15   :  { %521 = vmatprep.mubr.msk.bf16.mxu0 %vm567_vm2, %v566_v1  ;;  %p548_p3 = por %p547_p2, %p546_p1 }
  0x17   :  { %230 = vperm.xlu0 %529, %v216_v16   ;;  %235 = vperm.xlu1 %530, %v217_v17   ;;  %p549_p4 = pnand %p548_p3, %p542_p0 }
  0x1b   :  { %240 = vperm.xlu0 %529, %v218_v18   ;;  %245 = vperm.xlu1 %530, %v219_v19  }
  0x1f   :  { %250 = vperm.xlu0 %529, %v220_v20   ;;  %255 = vperm.xlu1 %530, %v221_v21  }
  0x23   :  { %260 = vperm.xlu0 %529, %v222_v22   ;;  %265 = vperm.xlu1 %530, %v223_v23  }
  0x27   :  { %382 = vperm.xlu0 %529, %v375_v24  }
  0x86   :  { %v53_v26 = vpop.permute.xlu0 %52  ;;  %v63_v27 = vpop.permute.xlu1 %62 }
  0x8a   :  { %v58_v28 = vpop.permute.xlu0 %57  ;;  %v68_v29 = vpop.permute.xlu1 %67 }
  0x8e   :  { %v73_v33 = vpop.permute.xlu0 %72  ;;  %v78_v38 = vpop.permute.xlu1 %77 }
  0x92   :  { %v83_v45 = vpop.permute.xlu0 %82  ;;  %v88_v50 = vpop.permute.xlu1 %87 }
  0x96   :  { %v231_v2 = vpop.permute.xlu0 %230  ;;  %v236_v3 = vpop.permute.xlu1 %235 }
  0x9a   :  { %v241_v4 = vpop.permute.xlu0 %240  ;;  %v246_v5 = vpop.permute.xlu1 %245 }
  0x9e   :  { %v251_v9 = vpop.permute.xlu0 %250  ;;  %v256_v14 = vpop.permute.xlu1 %255 }
  0xa2   :  { %v261_v21 = vpop.permute.xlu0 %260 }
  0xdf   :  { %v491_v30 = vpop.f32.mrb[0].mxu0 }
  0xe0   :  { %v178_v31 = vadd.f32 %v491_v30, %v63_v27  ;;  %v169_v32 = vpop.f32.mrb[1].mxu0 }
  0xe1   :  { %v170_v34 = vadd.f32 %v169_v32, %v53_v26  ;;  %v492_v35 = vpop.f32.mrb[2].mxu0  ;;  %v266_v26 = vpop.permute.xlu1 %265 }
  0xe2   :  { %v181_v36 = vadd.f32 %v492_v35, %v68_v29  ;;  %v172_v37 = vpop.f32.mrb[3].mxu0  ;;  %v202_v40 = vmax.f32 %v178_v31, 0.0 }
  0xe3   :  { %v173_v39 = vadd.f32 %v172_v37, %v58_v28  ;;  %v200_v42 = vmax.f32 %v170_v34, 0.0 }
  0xe4   :  { %v203_v41 = vmax.f32 %v181_v36, 0.0 }
  0xe5   :  { %v201_v43 = vmax.f32 %v173_v39, 0.0  ;;  %v385_v39 = vlaneseq }
  0xe6   :  { %v225_v44 = vpack.c.bf16 %v203_v41, %v202_v40 }
  0xe7   :  { %v495_v46 = vpop.f32.mrb[4].mxu0  ;;  %v224_v47 = vpack.c.bf16 %v201_v43, %v200_v42  ;;  %v386_v40 = vshrl.u32 %v385_v39, 7  ;;  %v383_v42 = vpop.permute.xlu0 %382 }
  0xe8   :  { %v194_v48 = vadd.f32 %v495_v46, %v83_v45  ;;  %v185_v49 = vpop.f32.mrb[5].mxu0 }
  0xe9   :  { %v186_v51 = vadd.f32 %v185_v49, %v73_v33  ;;  %v496_v52 = vpop.f32.mrb[6].mxu0  ;;  %497 = vmatprep.subr.bf16.mxu1 %v224_v47  ;;  %v387_v41 = vsub.s32 0, %v386_v40 }
  0xea   :  { %v197_v53 = vadd.f32 %v496_v52, %v88_v50  ;;  %v188_v54 = vpop.f32.mrb[7].mxu0  ;;  %498 = vmatpush3.bf16.msra.mxu1 %v224_v47  ;;  %v206_v56 = vmax.f32 %v194_v48, 0.0 }
  0xeb   :  { %v189_v55 = vadd.f32 %v188_v54, %v78_v38  ;;  %499 = vmatprep.subr.bf16.mxu1 %v225_v44  ;;  %v204_v58 = vmax.f32 %v186_v51, 0.0  ;;  %v374_v38 = vld [vmem:[%s719_s5] sm:$0x1]  ;;  %v388_v43 = vrot.slane %v383_v42, %v387_v41 }
  0xec   :  { %v207_v57 = vmax.f32 %v197_v53, 0.0 }
  0xed   :  { %v205_v59 = vmax.f32 %v189_v55, 0.0 }
  0xee   :  { %v227_v60 = vpack.c.bf16 %v207_v57, %v206_v56  ;;  %500 = vmatpush3.bf16.msra.mxu1 %v225_v44 }
  0xef   :  { %v226_v61 = vpack.c.bf16 %v205_v59, %v204_v58 }
  0xf1   :  { %501 = vmatprep.subr.bf16.mxu1 %v226_v61 }
  0xf2   :  { %502 = vmatpush3.bf16.msra.mxu1 %v226_v61 }
  0xf3   :  { %503 = vmatprep.subr.bf16.mxu1 %v227_v60 }
  0xf6   :  { %504 = vmatpush3.bf16.msra.mxu1 %v227_v60 }
  0xf9   :  { %506 = vmatmul.mubr.msk.bf16.vlgmr.msra.gmra.mrb[0].mxu1 %vm288_vm1, %v538_v62 }
  0xfa   :  { %509 = vmatprep.mubr.msk.bf16.mxu1 %vm288_vm1, %v539_v63 }
 0x101   :  { %510 = vmatmul.mubr.msk.bf16.gmra.mrb[4].mxu1 %vm288_vm1, %v540_v0 }
 0x1cc   :  { %v507_v6 = vpop.f32.mrb[0].mxu1 }
 0x1cd   :  { %v344_v7 = vadd.f32 %v507_v6, %v241_v4  ;;  %v335_v8 = vpop.f32.mrb[1].mxu1 }
 0x1ce   :  { %v336_v10 = vadd.f32 %v335_v8, %v231_v2  ;;  %v508_v11 = vpop.f32.mrb[2].mxu1 }
 0x1cf   :  { %v347_v12 = vadd.f32 %v508_v11, %v246_v5  ;;  %v338_v13 = vpop.f32.mrb[3].mxu1  ;;  %v368_v16 = vmax.f32 %v344_v7, 0.0 }
 0x1d0   :  { %v339_v15 = vadd.f32 %v338_v13, %v236_v3  ;;  %v366_v18 = vmax.f32 %v336_v10, 0.0 }
 0x1d1   :  { %v369_v17 = vmax.f32 %v347_v12, 0.0 }
 0x1d2   :  { %v367_v19 = vmax.f32 %v339_v15, 0.0 }
 0x1d3   :  { %v377_v20 = vpack.c.bf16 %v369_v17, %v368_v16 }
 0x1d4   :  { %v376_v22 = vpack.c.bf16 %v367_v19, %v366_v18  ;;  %v511_v23 = vpop.f32.mrb[4].mxu1 }
 0x1d5   :  { %v360_v24 = vadd.f32 %v511_v23, %v261_v21  ;;  %v351_v25 = vpop.f32.mrb[5].mxu1 }
 0x1d6   :  { %v352_v27 = vadd.f32 %v351_v25, %v251_v9  ;;  %v512_v28 = vpop.f32.mrb[6].mxu1  ;;  %514 = vmatpush3.bf16.msra.mxu0 %v376_v22 }
 0x1d7   :  { %v363_v29 = vadd.f32 %v512_v28, %v266_v26  ;;  %v354_v30 = vpop.f32.mrb[7].mxu1  ;;  %515 = vmatprep.subr.bf16.mxu0 %v566_v1  ;;  %v372_v32 = vmax.f32 %v360_v24, 0.0 }
 0x1d8   :  { %v355_v31 = vadd.f32 %v354_v30, %v256_v14  ;;  %v370_v34 = vmax.f32 %v352_v27, 0.0 }
 0x1d9   :  { %v373_v33 = vmax.f32 %v363_v29, 0.0 }
 0x1da   :  { %v371_v35 = vmax.f32 %v355_v31, 0.0  ;;  %516 = vmatpush3.bf16.msra.mxu0 %v377_v20 }
 0x1db   :  { %v379_v36 = vpack.c.bf16 %v373_v33, %v372_v32  ;;  %517 = vmatprep.subr.bf16.mxu0 %v566_v1 }
 0x1dc   :  { %v378_v37 = vpack.c.bf16 %v371_v35, %v370_v34 }
 0x1de   :  { %518 = vmatpush3.bf16.msra.mxu0 %v378_v37 }
 0x1df   :  { %519 = vmatprep.subr.bf16.mxu0 %v566_v1 }
 0x1e2   :  { %520 = vmatpush3.bf16.msra.mxu0 %v379_v36 }
 0x1e5   :  { %522 = vmatmul.mubr.msk.bf16.vlgmr.msra.gmra.mrb[8].mxu0 %vm288_vm1, %v374_v38 }
 0x2b8   :  { %v426_v44 = vpop.f32.mrb[8].mxu0 }
 0x2b9   :  { %v427_v45 = vadd.f32 %v426_v44, %v388_v43  ;;  %v523_v46 = vpop.f32.mrb[9].mxu0 }
 0x2ba   :  { %v429_v47 = vpop.f32.mrb[10].mxu0 }
 0x2bb   :  { %432 = vst [vmem:[#allocation3] sm:$0x1] %v427_v45  ;;  %v524_v48 = vpop.f32.mrb[11].mxu0 }
 0x2bc   :  { %552 = shalt.err (!%p549_p4)
}
 0x2bd   :  { %s553_s1 = scalar_lea.hbm %s721_s7, 16 }
 0x2be   :  { %p554_p5 = scmp.ne.s32.totalorder %s721_s7, %s553_s1  ;;  %p557_p6 = scmp.lt.u32.totalorder %s553_s1, %s721_s7 }
 0x2c0   :  { %p559_p7 = pnand %p557_p6, %p554_p5 }
 0x2c2   :  { %562 = shalt.err (!%p559_p7)
}
 0x2c3   :  { %442 = dma.vmem_to_hbm [thread:$0]  %s440_s27, 16, %s721_s7, [#allocation4]  }
 0x2c4   :  { %563 = dma.done.wait [#allocation4], 16  }
 0x2c5   :  { %564 = vsyncadd [#allocation4], 4294967280 }
 0x2c6   :  { %446 = vsyncpa [#allocation4], 1 }

</bundles_post_ra>
